<compile_context>
chip_gen: v7x
topology: tpu7x:2x2x1
jax: 0.10.0
libtpu: 0.0.40
codegen_flags: <defaults>
</compile_context>

<pallas_src>
import functools
from math import sqrt

import jax
import jax.numpy as jnp
import numpy as np
from jax import lax
from jax.experimental import pallas as pl
from jax.experimental.pallas import tpu as pltpu


def _round_up(x, m):
    return -(-x // m) * m


def _padded_vmem_bytes(shape, dtype, buffers=1):
    """Rough VMEM footprint of a tile, rounding the last two dims up to (8, 128)."""
    s = list(shape)
    if len(s) >= 1:
        s[-1] = _round_up(s[-1], 128)
    if len(s) >= 2:
        s[-2] = _round_up(s[-2], 8)
    n = 1
    for d in s:
        n *= d
    return buffers * n * jnp.dtype(dtype).itemsize


def _vmem_limit(estimate_bytes):
    """Explicit scoped-VMEM limit: 2x headroom, floored at 32 MiB, capped at 100 MiB."""
    return int(max(32 << 20, min(2 * estimate_bytes, 100 << 20)))


# ----------------------------------------------------------------------------------
# K/V projection: batch-invariant, tiled over S, emitted directly head-major (H, S, E)
# ----------------------------------------------------------------------------------
def _kv_projection_kernel(src_ref, val_ref, wk_ref, bk_ref, wv_ref, bv_ref,
                          kh_ref, vh_ref, *, n_heads):
    # src_ref/val_ref : (s_tile, d_llm)
    # wk_ref/wv_ref   : (H, d_llm, E)   head-major weights (trace-time reshape)
    # bk_ref/bv_ref   : (H, 1, E)       f32 biases
    # kh_ref/vh_ref   : (H, s_tile, E)  outputs, head-major (no in-kernel transpose)
    for h in range(n_heads):  # static unroll; H is small, leading-axis slices are views
        kh_ref[h] = (jnp.dot(src_ref[...], wk_ref[h],
                             preferred_element_type=jnp.float32)
                     + bk_ref[h]).astype(kh_ref.dtype)
        vh_ref[h] = (jnp.dot(val_ref[...], wv_ref[h],
                             preferred_element_type=jnp.float32)
                     + bv_ref[h]).astype(vh_ref.dtype)


# ----------------------------------------------------------------------------------
# Attention kernel: row tiles (parallel) x S tiles (arbitrary), online softmax.
# ----------------------------------------------------------------------------------
def _attention_kernel(x_ref, kh_ref, vh_ref, wq_ref, bq_ref, wo_ref, bo_ref,
                      out_ref, q_sc, m_sc, l_sc, acc_sc,
                      *, n_heads, approx_recip):
    # x_ref  : (rb, d_model)      row tile of flattened (B*L, d_model) target
    # kh_ref : (H, s_tile, E)     streamed K heads (double-buffered)
    # vh_ref : (H, s_tile, E)     streamed V heads (double-buffered)
    # wq_ref : (H, d_model, E)    head-major Q weights, 1/sqrt(E) folded in (Buffered(1))
    # bq_ref : (H, 1, E)          scaled f32 bias (Buffered(1))
    # wo_ref : (H*E, d_llm)       output projection (Buffered(1))
    # bo_ref : (1, d_llm)         f32 bias (Buffered(1))
    si = pl.program_id(1)
    n_s = pl.num_programs(1)
    rb = x_ref.shape[0]

    @pl.when(si == 0)
    def _init():
        # Q projection once per row tile (amortised over all S tiles), written directly
        # head-major into scratch -> no per-step (rb, H*E) -> (H, rb, E) relayout.
        for h in range(n_heads):  # static unroll
            q_sc[h] = (jnp.dot(x_ref[...], wq_ref[h],
                               preferred_element_type=jnp.float32)
                       + bq_ref[h]).astype(q_sc.dtype)
        m_sc[...] = jnp.full(m_sc.shape, -jnp.inf, m_sc.dtype)
        l_sc[...] = jnp.zeros(l_sc.shape, l_sc.dtype)
        acc_sc[...] = jnp.zeros(acc_sc.shape, acc_sc.dtype)

    # scores[h, m, s] = sum_e q[h, m, e] * k[h, s, e]   (batched over heads, f32 acc)
    s = lax.dot_general(q_sc[...], kh_ref[...],
                        dimension_numbers=(((2,), (2,)), ((0,), (0,))),
                        preferred_element_type=jnp.float32)          # (H, rb, ts) f32

    # Online softmax statistics in f32.  Normalisation is deferred: accumulate
    # exp(s - m) @ V unnormalised, divide by l once at the end on the (H, rb, E) acc.
    m_prev = m_sc[...]
    m_new = jnp.maximum(m_prev, jnp.max(s, axis=-1, keepdims=True))
    alpha = jnp.exp(m_prev - m_new)
    p = jnp.exp(s - m_new)
    l_sc[...] = alpha * l_sc[...] + jnp.sum(p, axis=-1, keepdims=True)
    acc_sc[...] = alpha * acc_sc[...] + lax.dot_general(
        p.astype(vh_ref.dtype), vh_ref[...],
        dimension_numbers=(((2,), (1,)), ((0,), (0,))),
        preferred_element_type=jnp.float32)                          # (H, rb, E) f32
    m_sc[...] = m_new

    @pl.when(si == n_s - 1)
    def _finalize():
        if approx_recip:
            inv = pl.reciprocal(l_sc[...], approx=True)              # EUP reciprocal
        else:
            inv = 1.0 / l_sc[...]                                    # exact f32 path
        o = acc_sc[...] * inv                                        # (H, rb, E) f32
        # Single fused output projection: one XLU relayout to (rb, H*E), then one
        # matmul with contraction over the full H*E width.
        o_flat = o.transpose(1, 0, 2).reshape(rb, -1).astype(wo_ref.dtype)
        y = jnp.dot(o_flat, wo_ref[...],
                    preferred_element_type=jnp.float32) + bo_ref[...]
        out_ref[...] = y.astype(out_ref.dtype)
        # TODO(synk): attention dropout (p=0.1) is identity in eval mode; not applied.


# ----------------------------------------------------------------------------------
# Wrapper
# ----------------------------------------------------------------------------------
def reprogramming_layer(target, source, value, params, *, n_heads,
                        mxu_dtype=None, approx_recip=None,
                        row_block=256, s_block=512, kv_s_block=512):
    """target: (B, L, d_model); source/value: (S, d_llm). Returns (B, L, d_llm).

    mxu_dtype: optional dtype (e.g. jnp.bfloat16) for the MXU operands — recommended
    on v5e/v6e/v7x (halves K/V DMA bytes and VMEM); softmax statistics / accumulation
    always stay f32.  approx_recip: use the EUP approximate reciprocal for the softmax
    denominator (defaults to True on the bf16-MXU path).
    """
    B, L, d_model = target.shape
    S, d_llm = source.shape
    wq, bq, wk, bk, wv, bv, wo, bo = params
    hk = wq.shape[1]                              # H * E
    H = n_heads
    E = hk // H
    out_dtype = target.dtype
    cdt = mxu_dtype if mxu_dtype is not None else target.dtype
    if approx_recip is None:
        approx_recip = (cdt == jnp.bfloat16)

    # ---- trace-time weight prep: head-major weights, scale folded into Q projection ----
    scale = 1.0 / sqrt(E)
    wq_h = (wq * scale).reshape(d_model, H, E).transpose(1, 0, 2).astype(cdt)  # (H, dm, E)
    bq_h = (bq * scale).reshape(H, 1, E).astype(jnp.float32)                   # (H, 1, E)
    wk_h = wk.reshape(d_llm, H, E).transpose(1, 0, 2).astype(cdt)              # (H, dllm, E)
    bk_h = bk.reshape(H, 1, E).astype(jnp.float32)
    wv_h = wv.reshape(d_llm, H, E).transpose(1, 0, 2).astype(cdt)
    bv_h = bv.reshape(H, 1, E).astype(jnp.float32)
    wo_c = wo.astype(cdt)                                                      # (H*E, dllm)
    bo_f = bo.astype(jnp.float32)                                              # (1, dllm)

    def _const_spec(shape):
        nd = len(shape)
        return pl.BlockSpec(shape, lambda *_, nd=nd: (0,) * nd,
                            pipeline_mode=pl.Buffered(1))   # single-buffer invariants

    # ---- K/V projection: tiled over S, batch-invariant, head-major output ----
    kv_tile = kv_s_block if (S % kv_s_block == 0) else S
    # TODO(synk): pad + mask S for production sizes where no S tile divides it.
    kv_est = (2 * _padded_vmem_bytes((kv_tile, d_llm), cdt, 2)
              + 2 * _padded_vmem_bytes((H, d_llm, E), cdt, 1)
              + 2 * _padded_vmem_bytes((H, 1, E), jnp.float32, 1)
              + 2 * _padded_vmem_bytes((H, kv_tile, E), cdt, 2))
    kh, vh = pl.pallas_call(
        functools.partial(_kv_projection_kernel, n_heads=H),
        out_shape=(jax.ShapeDtypeStruct((H, S, E), cdt),
                   jax.ShapeDtypeStruct((H, S, E), cdt)),
        grid_spec=pltpu.PrefetchScalarGridSpec(
            num_scalar_prefetch=0,
            grid=(pl.cdiv(S, kv_tile),),
            in_specs=[
                pl.BlockSpec((kv_tile, d_llm), lambda i: (i, 0)),
                pl.BlockSpec((kv_tile, d_llm), lambda i: (i, 0)),
                _const_spec((H, d_llm, E)),
                _const_spec((H, 1, E)),
                _const_spec((H, d_llm, E)),
                _const_spec((H, 1, E)),
            ],
            out_specs=(pl.BlockSpec((H, kv_tile, E), lambda i: (0, i, 0)),
                       pl.BlockSpec((H, kv_tile, E), lambda i: (0, i, 0))),
        ),
        compiler_params=pltpu.CompilerParams(
            dimension_semantics=("parallel",),
            vmem_limit_bytes=_vmem_limit(kv_est)),
    )(source.astype(cdt), value.astype(cdt), wk_h, bk_h, wv_h, bv_h)

    # ---- attention + fused output projection: rows (parallel) x S tiles (arbitrary) ----
    n_rows = B * L
    x = target.reshape(n_rows, d_model).astype(cdt)
    rb = min(row_block, n_rows)
    s_tile = s_block if (S % s_block == 0) else S
    grid = (pl.cdiv(n_rows, rb), pl.cdiv(S, s_tile))

    attn_est = (_padded_vmem_bytes((rb, d_model), cdt, 2)
                + 2 * _padded_vmem_bytes((H, s_tile, E), cdt, 2)
                + _padded_vmem_bytes((H, d_model, E), cdt, 1)
                + _padded_vmem_bytes((H, 1, E), jnp.float32, 1)
                + _padded_vmem_bytes((hk, d_llm), cdt, 1)
                + _padded_vmem_bytes((1, d_llm), jnp.float32, 1)
                + _padded_vmem_bytes((rb, d_llm), out_dtype, 2)
                + _padded_vmem_bytes((H, rb, E), cdt, 1)              # q scratch
                + 2 * _padded_vmem_bytes((H, rb, 1), jnp.float32, 1)  # m, l scratch
                + _padded_vmem_bytes((H, rb, E), jnp.float32, 1)      # acc scratch
                + 2 * _padded_vmem_bytes((H, rb, s_tile), jnp.float32, 1))  # scores/exp

    kernel = functools.partial(_attention_kernel, n_heads=H, approx_recip=approx_recip)

    y = pl.pallas_call(
        kernel,
        out_shape=jax.ShapeDtypeStruct((n_rows, d_llm), out_dtype),
        grid_spec=pltpu.PrefetchScalarGridSpec(
            num_scalar_prefetch=0,
            grid=grid,
            in_specs=[
                pl.BlockSpec((rb, d_model), lambda r, s: (r, 0)),      # row tile
                pl.BlockSpec((H, s_tile, E), lambda r, s: (0, s, 0)),  # K heads (streamed)
                pl.BlockSpec((H, s_tile, E), lambda r, s: (0, s, 0)),  # V heads (streamed)
                _const_spec((H, d_model, E)),                          # Q weights
                _const_spec((H, 1, E)),                                # Q bias
                _const_spec((hk, d_llm)),                              # out projection
                _const_spec((1, d_llm)),                               # out bias
            ],
            out_specs=pl.BlockSpec((rb, d_llm), lambda r, s: (r, 0)),
            scratch_shapes=[
                pltpu.VMEM((H, rb, E), cdt),           # Q heads (filled at s == 0)
                pltpu.VMEM((H, rb, 1), jnp.float32),   # running max
                pltpu.VMEM((H, rb, 1), jnp.float32),   # running denom
                pltpu.VMEM((H, rb, E), jnp.float32),   # unnormalised PV accumulator
            ]),
        compiler_params=pltpu.CompilerParams(
            dimension_semantics=("parallel", "arbitrary"),
            vmem_limit_bytes=_vmem_limit(attn_est)),
    )(x, kh, vh, wq_h, bq_h, wo_c, bo_f)

    return y.reshape(B, L, d_llm)


# ----------------------------------------------------------------------------------
# Pure-JAX reference matching the PyTorch forward (eval mode)
# ----------------------------------------------------------------------------------
def reference(target, source, value, params, *, n_heads):
    B, L, _ = target.shape
    S, _ = source.shape
    wq, bq, wk, bk, wv, bv, wo, bo = params
    H = n_heads
    q = (target @ wq + bq).reshape(B, L, H, -1)
    k = (source @ wk + bk).reshape(S, H, -1)
    v = (value @ wv + bv).reshape(S, H, -1)
    E = q.shape[-1]
    scores = jnp.einsum('blhe,she->bhls', q, k)
    A = jax.nn.softmax(scores / sqrt(E), axis=-1)
    out = jnp.einsum('bhls,she->blhe', A, v).reshape(B, L, H * E)
    return out @ wo + bo


if __name__ == "__main__":
    # Small shapes consistent with the module.
    B, L, S = 4, 8, 16
    d_model, n_heads, d_llm = 32, 4, 64
    d_keys = d_model // n_heads            # 8
    hk = d_keys * n_heads                  # 32

    key = jax.random.PRNGKey(0)
    ks = jax.random.split(key, 12)
    dt = jnp.float32

    target = jax.random.normal(ks[0], (B, L, d_model), dt)
    source = jax.random.normal(ks[1], (S, d_llm), dt)
    value = jax.random.normal(ks[2], (S, d_llm), dt)

    # Weights pre-transposed to (in, out); biases (1, out).
    wq = 0.05 * jax.random.normal(ks[3], (d_model, hk), dt)
    bq = 0.05 * jax.random.normal(ks[4], (1, hk), dt)
    wk = 0.05 * jax.random.normal(ks[5], (d_llm, hk), dt)
    bk = 0.05 * jax.random.normal(ks[6], (1, hk), dt)
    wv = 0.05 * jax.random.normal(ks[7], (d_llm, hk), dt)
    bv = 0.05 * jax.random.normal(ks[8], (1, hk), dt)
    wo = 0.05 * jax.random.normal(ks[9], (hk, d_llm), dt)
    bo = 0.05 * jax.random.normal(ks[10], (1, d_llm), dt)
    params = (wq, bq, wk, bk, wv, bv, wo, bo)

    ref = reference(target, source, value, params, n_heads=n_heads)

    # f32 path: small row/S tiles so the multi-program grid and the online-softmax
    # accumulation across S tiles are actually exercised.  Exact softmax divide.
    out = reprogramming_layer(target, source, value, params, n_heads=n_heads,
                              row_block=16, s_block=8, kv_s_block=8)
    out = jax.block_until_ready(out)
    np.testing.assert_allclose(np.asarray(out), np.asarray(ref), rtol=2e-5, atol=2e-5)

    # bf16-MXU fast path (recommended on v5e/v6e/v7x): f32 softmax/accumulation,
    # approximate EUP reciprocal; looser tolerance expected.
    out_bf16 = reprogramming_layer(target, source, value, params, n_heads=n_heads,
                                   row_block=16, s_block=8, kv_s_block=8,
                                   mxu_dtype=jnp.bfloat16)
    out_bf16 = jax.block_until_ready(out_bf16)
    np.testing.assert_allclose(np.asarray(out_bf16), np.asarray(ref),
                               rtol=3e-2, atol=2e-2)

    print("KERNEL_OK")
</pallas_src>

<mosaic_0001>
module attributes {stable_mosaic.version = 11 : i64} {
  func.func @_kv_projection_kernel(%arg0: i32, %arg1: memref<8x64xf32, #tpu.memory_space<vmem>>, %arg2: memref<8x64xf32, #tpu.memory_space<vmem>>, %arg3: memref<4x64x8xf32, #tpu.memory_space<vmem>>, %arg4: memref<4x1x8xf32, #tpu.memory_space<vmem>>, %arg5: memref<4x64x8xf32, #tpu.memory_space<vmem>>, %arg6: memref<4x1x8xf32, #tpu.memory_space<vmem>>, %arg7: memref<4x8x8xf32, #tpu.memory_space<vmem>>, %arg8: memref<4x8x8xf32, #tpu.memory_space<vmem>>) attributes {dimension_semantics = [#tpu.dimension_semantics<parallel>], iteration_bounds = array<i64: 2>, scalar_prefetch = 0 : i64, scratch_operands = 0 : i64, tpu.core_type = #tpu.core_type<tc>, window_params = [{transform_indices = @transform_0, window_bounds = array<i64: 8, 64>}, {transform_indices = @transform_1, window_bounds = array<i64: 8, 64>}, {pipeline_mode = #tpu.pipeline_mode<synchronous>, transform_indices = @transform_2, window_bounds = array<i64: 4, 64, 8>}, {pipeline_mode = #tpu.pipeline_mode<synchronous>, transform_indices = @transform_3, window_bounds = array<i64: 4, 1, 8>}, {pipeline_mode = #tpu.pipeline_mode<synchronous>, transform_indices = @transform_4, window_bounds = array<i64: 4, 64, 8>}, {pipeline_mode = #tpu.pipeline_mode<synchronous>, transform_indices = @transform_5, window_bounds = array<i64: 4, 1, 8>}, {transform_indices = @transform_6, window_bounds = array<i64: 4, 8, 8>}, {transform_indices = @transform_7, window_bounds = array<i64: 4, 8, 8>}]} {
    %c0 = arith.constant 0 : index
    %c0_0 = arith.constant 0 : index
    %0 = vector.load %arg1[%c0, %c0_0] : memref<8x64xf32, #tpu.memory_space<vmem>>, vector<8x64xf32>
    %c0_1 = arith.constant 0 : index
    %c0_2 = arith.constant 0 : index
    %c0_3 = arith.constant 0 : index
    %1 = vector.load %arg3[%c0_1, %c0_2, %c0_3] : memref<4x64x8xf32, #tpu.memory_space<vmem>>, vector<1x64x8xf32>
    %2 = vector.shape_cast %1 : vector<1x64x8xf32> to vector<64x8xf32>
    %cst = arith.constant dense<0.000000e+00> : vector<8x8xf32>
    %3 = tpu.matmul %0, %2, %cst {dimension_numbers = #tpu.dot_dimension_numbers<[1], [0], [0], [1], [0, 0, 1, 1], [], []>} : vector<8x64xf32>, vector<64x8xf32>, vector<8x8xf32> -> vector<8x8xf32>
    %c0_4 = arith.constant 0 : index
    %c0_5 = arith.constant 0 : index
    %c0_6 = arith.constant 0 : index
    %4 = vector.load %arg4[%c0_4, %c0_5, %c0_6] : memref<4x1x8xf32, #tpu.memory_space<vmem>>, vector<1x1x8xf32>
    %5 = vector.shape_cast %4 : vector<1x1x8xf32> to vector<1x8xf32>
    %6 = vector.broadcast %5 : vector<1x8xf32> to vector<8x8xf32>
    %7 = arith.addf %3, %6 : vector<8x8xf32>
    %c0_7 = arith.constant 0 : index
    %c0_8 = arith.constant 0 : index
    %c0_9 = arith.constant 0 : index
    %8 = vector.load %arg7[%c0_7, %c0_8, %c0_9] : memref<4x8x8xf32, #tpu.memory_space<vmem>>, vector<1x8x8xf32>
    %9 = vector.shape_cast %8 : vector<1x8x8xf32> to vector<8x8xf32>
    %10 = vector.shape_cast %7 : vector<8x8xf32> to vector<1x8x8xf32>
    tpu.vector_store %arg7[%c0_7, %c0_8, %c0_9], %10 {strides = array<i32>} : memref<4x8x8xf32, #tpu.memory_space<vmem>>, vector<1x8x8xf32>,
    %c0_10 = arith.constant 0 : index
    %c0_11 = arith.constant 0 : index
    %11 = vector.load %arg2[%c0_10, %c0_11] : memref<8x64xf32, #tpu.memory_space<vmem>>, vector<8x64xf32>
    %c0_12 = arith.constant 0 : index
    %c0_13 = arith.constant 0 : index
    %c0_14 = arith.constant 0 : index
    %12 = vector.load %arg5[%c0_12, %c0_13, %c0_14] : memref<4x64x8xf32, #tpu.memory_space<vmem>>, vector<1x64x8xf32>
    %13 = vector.shape_cast %12 : vector<1x64x8xf32> to vector<64x8xf32>
    %cst_15 = arith.constant dense<0.000000e+00> : vector<8x8xf32>
    %14 = tpu.matmul %11, %13, %cst_15 {dimension_numbers = #tpu.dot_dimension_numbers<[1], [0], [0], [1], [0, 0, 1, 1], [], []>} : vector<8x64xf32>, vector<64x8xf32>, vector<8x8xf32> -> vector<8x8xf32>
    %c0_16 = arith.constant 0 : index
    %c0_17 = arith.constant 0 : index
    %c0_18 = arith.constant 0 : index
    %15 = vector.load %arg6[%c0_16, %c0_17, %c0_18] : memref<4x1x8xf32, #tpu.memory_space<vmem>>, vector<1x1x8xf32>
    %16 = vector.shape_cast %15 : vector<1x1x8xf32> to vector<1x8xf32>
    %17 = vector.broadcast %16 : vector<1x8xf32> to vector<8x8xf32>
    %18 = arith.addf %14, %17 : vector<8x8xf32>
    %c0_19 = arith.constant 0 : index
    %c0_20 = arith.constant 0 : index
    %c0_21 = arith.constant 0 : index
    %19 = vector.load %arg8[%c0_19, %c0_20, %c0_21] : memref<4x8x8xf32, #tpu.memory_space<vmem>>, vector<1x8x8xf32>
    %20 = vector.shape_cast %19 : vector<1x8x8xf32> to vector<8x8xf32>
    %21 = vector.shape_cast %18 : vector<8x8xf32> to vector<1x8x8xf32>
    tpu.vector_store %arg8[%c0_19, %c0_20, %c0_21], %21 {strides = array<i32>} : memref<4x8x8xf32, #tpu.memory_space<vmem>>, vector<1x8x8xf32>,
    %c0_22 = arith.constant 0 : index
    %c0_23 = arith.constant 0 : index
    %22 = vector.load %arg1[%c0_22, %c0_23] : memref<8x64xf32, #tpu.memory_space<vmem>>, vector<8x64xf32>
    %c1 = arith.constant 1 : index
    %c0_24 = arith.constant 0 : index
    %c0_25 = arith.constant 0 : index
    %23 = vector.load %arg3[%c1, %c0_24, %c0_25] : memref<4x64x8xf32, #tpu.memory_space<vmem>>, vector<1x64x8xf32>
    %24 = vector.shape_cast %23 : vector<1x64x8xf32> to vector<64x8xf32>
    %cst_26 = arith.constant dense<0.000000e+00> : vector<8x8xf32>
    %25 = tpu.matmul %22, %24, %cst_26 {dimension_numbers = #tpu.dot_dimension_numbers<[1], [0], [0], [1], [0, 0, 1, 1], [], []>} : vector<8x64xf32>, vector<64x8xf32>, vector<8x8xf32> -> vector<8x8xf32>
    %c1_27 = arith.constant 1 : index
    %c0_28 = arith.constant 0 : index
    %c0_29 = arith.constant 0 : index
    %26 = vector.load %arg4[%c1_27, %c0_28, %c0_29] : memref<4x1x8xf32, #tpu.memory_space<vmem>>, vector<1x1x8xf32>
    %27 = vector.shape_cast %26 : vector<1x1x8xf32> to vector<1x8xf32>
    %28 = vector.broadcast %27 : vector<1x8xf32> to vector<8x8xf32>
    %29 = arith.addf %25, %28 : vector<8x8xf32>
    %c1_30 = arith.constant 1 : index
    %c0_31 = arith.constant 0 : index
    %c0_32 = arith.constant 0 : index
    %30 = vector.load %arg7[%c1_30, %c0_31, %c0_32] : memref<4x8x8xf32, #tpu.memory_space<vmem>>, vector<1x8x8xf32>
    %31 = vector.shape_cast %30 : vector<1x8x8xf32> to vector<8x8xf32>
    %32 = vector.shape_cast %29 : vector<8x8xf32> to vector<1x8x8xf32>
    tpu.vector_store %arg7[%c1_30, %c0_31, %c0_32], %32 {strides = array<i32>} : memref<4x8x8xf32, #tpu.memory_space<vmem>>, vector<1x8x8xf32>,
    %c0_33 = arith.constant 0 : index
    %c0_34 = arith.constant 0 : index
    %33 = vector.load %arg2[%c0_33, %c0_34] : memref<8x64xf32, #tpu.memory_space<vmem>>, vector<8x64xf32>
    %c1_35 = arith.constant 1 : index
    %c0_36 = arith.constant 0 : index
    %c0_37 = arith.constant 0 : index
    %34 = vector.load %arg5[%c1_35, %c0_36, %c0_37] : memref<4x64x8xf32, #tpu.memory_space<vmem>>, vector<1x64x8xf32>
    %35 = vector.shape_cast %34 : vector<1x64x8xf32> to vector<64x8xf32>
    %cst_38 = arith.constant dense<0.000000e+00> : vector<8x8xf32>
    %36 = tpu.matmul %33, %35, %cst_38 {dimension_numbers = #tpu.dot_dimension_numbers<[1], [0], [0], [1], [0, 0, 1, 1], [], []>} : vector<8x64xf32>, vector<64x8xf32>, vector<8x8xf32> -> vector<8x8xf32>
    %c1_39 = arith.constant 1 : index
    %c0_40 = arith.constant 0 : index
    %c0_41 = arith.constant 0 : index
    %37 = vector.load %arg6[%c1_39, %c0_40, %c0_41] : memref<4x1x8xf32, #tpu.memory_space<vmem>>, vector<1x1x8xf32>
    %38 = vector.shape_cast %37 : vector<1x1x8xf32> to vector<1x8xf32>
    %39 = vector.broadcast %38 : vector<1x8xf32> to vector<8x8xf32>
    %40 = arith.addf %36, %39 : vector<8x8xf32>
    %c1_42 = arith.constant 1 : index
    %c0_43 = arith.constant 0 : index
    %c0_44 = arith.constant 0 : index
    %41 = vector.load %arg8[%c1_42, %c0_43, %c0_44] : memref<4x8x8xf32, #tpu.memory_space<vmem>>, vector<1x8x8xf32>
    %42 = vector.shape_cast %41 : vector<1x8x8xf32> to vector<8x8xf32>
    %43 = vector.shape_cast %40 : vector<8x8xf32> to vector<1x8x8xf32>
    tpu.vector_store %arg8[%c1_42, %c0_43, %c0_44], %43 {strides = array<i32>} : memref<4x8x8xf32, #tpu.memory_space<vmem>>, vector<1x8x8xf32>,
    %c0_45 = arith.constant 0 : index
    %c0_46 = arith.constant 0 : index
    %44 = vector.load %arg1[%c0_45, %c0_46] : memref<8x64xf32, #tpu.memory_space<vmem>>, vector<8x64xf32>
    %c2 = arith.constant 2 : index
    %c0_47 = arith.constant 0 : index
    %c0_48 = arith.constant 0 : index
    %45 = vector.load %arg3[%c2, %c0_47, %c0_48] : memref<4x64x8xf32, #tpu.memory_space<vmem>>, vector<1x64x8xf32>
    %46 = vector.shape_cast %45 : vector<1x64x8xf32> to vector<64x8xf32>
    %cst_49 = arith.constant dense<0.000000e+00> : vector<8x8xf32>
    %47 = tpu.matmul %44, %46, %cst_49 {dimension_numbers = #tpu.dot_dimension_numbers<[1], [0], [0], [1], [0, 0, 1, 1], [], []>} : vector<8x64xf32>, vector<64x8xf32>, vector<8x8xf32> -> vector<8x8xf32>
    %c2_50 = arith.constant 2 : index
    %c0_51 = arith.constant 0 : index
    %c0_52 = arith.constant 0 : index
    %48 = vector.load %arg4[%c2_50, %c0_51, %c0_52] : memref<4x1x8xf32, #tpu.memory_space<vmem>>, vector<1x1x8xf32>
    %49 = vector.shape_cast %48 : vector<1x1x8xf32> to vector<1x8xf32>
    %50 = vector.broadcast %49 : vector<1x8xf32> to vector<8x8xf32>
    %51 = arith.addf %47, %50 : vector<8x8xf32>
    %c2_53 = arith.constant 2 : index
    %c0_54 = arith.constant 0 : index
    %c0_55 = arith.constant 0 : index
    %52 = vector.load %arg7[%c2_53, %c0_54, %c0_55] : memref<4x8x8xf32, #tpu.memory_space<vmem>>, vector<1x8x8xf32>
    %53 = vector.shape_cast %52 : vector<1x8x8xf32> to vector<8x8xf32>
    %54 = vector.shape_cast %51 : vector<8x8xf32> to vector<1x8x8xf32>
    tpu.vector_store %arg7[%c2_53, %c0_54, %c0_55], %54 {strides = array<i32>} : memref<4x8x8xf32, #tpu.memory_space<vmem>>, vector<1x8x8xf32>,
    %c0_56 = arith.constant 0 : index
    %c0_57 = arith.constant 0 : index
    %55 = vector.load %arg2[%c0_56, %c0_57] : memref<8x64xf32, #tpu.memory_space<vmem>>, vector<8x64xf32>
    %c2_58 = arith.constant 2 : index
    %c0_59 = arith.constant 0 : index
    %c0_60 = arith.constant 0 : index
    %56 = vector.load %arg5[%c2_58, %c0_59, %c0_60] : memref<4x64x8xf32, #tpu.memory_space<vmem>>, vector<1x64x8xf32>
    %57 = vector.shape_cast %56 : vector<1x64x8xf32> to vector<64x8xf32>
    %cst_61 = arith.constant dense<0.000000e+00> : vector<8x8xf32>
    %58 = tpu.matmul %55, %57, %cst_61 {dimension_numbers = #tpu.dot_dimension_numbers<[1], [0], [0], [1], [0, 0, 1, 1], [], []>} : vector<8x64xf32>, vector<64x8xf32>, vector<8x8xf32> -> vector<8x8xf32>
    %c2_62 = arith.constant 2 : index
    %c0_63 = arith.constant 0 : index
    %c0_64 = arith.constant 0 : index
    %59 = vector.load %arg6[%c2_62, %c0_63, %c0_64] : memref<4x1x8xf32, #tpu.memory_space<vmem>>, vector<1x1x8xf32>
    %60 = vector.shape_cast %59 : vector<1x1x8xf32> to vector<1x8xf32>
    %61 = vector.broadcast %60 : vector<1x8xf32> to vector<8x8xf32>
    %62 = arith.addf %58, %61 : vector<8x8xf32>
    %c2_65 = arith.constant 2 : index
    %c0_66 = arith.constant 0 : index
    %c0_67 = arith.constant 0 : index
    %63 = vector.load %arg8[%c2_65, %c0_66, %c0_67] : memref<4x8x8xf32, #tpu.memory_space<vmem>>, vector<1x8x8xf32>
    %64 = vector.shape_cast %63 : vector<1x8x8xf32> to vector<8x8xf32>
    %65 = vector.shape_cast %62 : vector<8x8xf32> to vector<1x8x8xf32>
    tpu.vector_store %arg8[%c2_65, %c0_66, %c0_67], %65 {strides = array<i32>} : memref<4x8x8xf32, #tpu.memory_space<vmem>>, vector<1x8x8xf32>,
    %c0_68 = arith.constant 0 : index
    %c0_69 = arith.constant 0 : index
    %66 = vector.load %arg1[%c0_68, %c0_69] : memref<8x64xf32, #tpu.memory_space<vmem>>, vector<8x64xf32>
    %c3 = arith.constant 3 : index
    %c0_70 = arith.constant 0 : index
    %c0_71 = arith.constant 0 : index
    %67 = vector.load %arg3[%c3, %c0_70, %c0_71] : memref<4x64x8xf32, #tpu.memory_space<vmem>>, vector<1x64x8xf32>
    %68 = vector.shape_cast %67 : vector<1x64x8xf32> to vector<64x8xf32>
    %cst_72 = arith.constant dense<0.000000e+00> : vector<8x8xf32>
    %69 = tpu.matmul %66, %68, %cst_72 {dimension_numbers = #tpu.dot_dimension_numbers<[1], [0], [0], [1], [0, 0, 1, 1], [], []>} : vector<8x64xf32>, vector<64x8xf32>, vector<8x8xf32> -> vector<8x8xf32>
    %c3_73 = arith.constant 3 : index
    %c0_74 = arith.constant 0 : index
    %c0_75 = arith.constant 0 : index
    %70 = vector.load %arg4[%c3_73, %c0_74, %c0_75] : memref<4x1x8xf32, #tpu.memory_space<vmem>>, vector<1x1x8xf32>
    %71 = vector.shape_cast %70 : vector<1x1x8xf32> to vector<1x8xf32>
    %72 = vector.broadcast %71 : vector<1x8xf32> to vector<8x8xf32>
    %73 = arith.addf %69, %72 : vector<8x8xf32>
    %c3_76 = arith.constant 3 : index
    %c0_77 = arith.constant 0 : index
    %c0_78 = arith.constant 0 : index
    %74 = vector.load %arg7[%c3_76, %c0_77, %c0_78] : memref<4x8x8xf32, #tpu.memory_space<vmem>>, vector<1x8x8xf32>
    %75 = vector.shape_cast %74 : vector<1x8x8xf32> to vector<8x8xf32>
    %76 = vector.shape_cast %73 : vector<8x8xf32> to vector<1x8x8xf32>
    tpu.vector_store %arg7[%c3_76, %c0_77, %c0_78], %76 {strides = array<i32>} : memref<4x8x8xf32, #tpu.memory_space<vmem>>, vector<1x8x8xf32>,
    %c0_79 = arith.constant 0 : index
    %c0_80 = arith.constant 0 : index
    %77 = vector.load %arg2[%c0_79, %c0_80] : memref<8x64xf32, #tpu.memory_space<vmem>>, vector<8x64xf32>
    %c3_81 = arith.constant 3 : index
    %c0_82 = arith.constant 0 : index
    %c0_83 = arith.constant 0 : index
    %78 = vector.load %arg5[%c3_81, %c0_82, %c0_83] : memref<4x64x8xf32, #tpu.memory_space<vmem>>, vector<1x64x8xf32>
    %79 = vector.shape_cast %78 : vector<1x64x8xf32> to vector<64x8xf32>
    %cst_84 = arith.constant dense<0.000000e+00> : vector<8x8xf32>
    %80 = tpu.matmul %77, %79, %cst_84 {dimension_numbers = #tpu.dot_dimension_numbers<[1], [0], [0], [1], [0, 0, 1, 1], [], []>} : vector<8x64xf32>, vector<64x8xf32>, vector<8x8xf32> -> vector<8x8xf32>
    %c3_85 = arith.constant 3 : index
    %c0_86 = arith.constant 0 : index
    %c0_87 = arith.constant 0 : index
    %81 = vector.load %arg6[%c3_85, %c0_86, %c0_87] : memref<4x1x8xf32, #tpu.memory_space<vmem>>, vector<1x1x8xf32>
    %82 = vector.shape_cast %81 : vector<1x1x8xf32> to vector<1x8xf32>
    %83 = vector.broadcast %82 : vector<1x8xf32> to vector<8x8xf32>
    %84 = arith.addf %80, %83 : vector<8x8xf32>
    %c3_88 = arith.constant 3 : index
    %c0_89 = arith.constant 0 : index
    %c0_90 = arith.constant 0 : index
    %85 = vector.load %arg8[%c3_88, %c0_89, %c0_90] : memref<4x8x8xf32, #tpu.memory_space<vmem>>, vector<1x8x8xf32>
    %86 = vector.shape_cast %85 : vector<1x8x8xf32> to vector<8x8xf32>
    %87 = vector.shape_cast %84 : vector<8x8xf32> to vector<1x8x8xf32>
    tpu.vector_store %arg8[%c3_88, %c0_89, %c0_90], %87 {strides = array<i32>} : memref<4x8x8xf32, #tpu.memory_space<vmem>>, vector<1x8x8xf32>,
    return
  }
  func.func @transform_0(%arg0: i32) -> (i32, i32) {
    %c0_i32 = arith.constant 0 : i32
    %c0_i32_0 = arith.constant 0 : i32
    return %arg0, %c0_i32 : i32, i32
  }
  func.func @transform_1(%arg0: i32) -> (i32, i32) {
    %c0_i32 = arith.constant 0 : i32
    %c0_i32_0 = arith.constant 0 : i32
    return %arg0, %c0_i32 : i32, i32
  }
  func.func @transform_2(%arg0: i32) -> (i32, i32, i32) {
    %c0_i32 = arith.constant 0 : i32
    %c0_i32_0 = arith.constant 0 : i32
    %c0_i32_1 = arith.constant 0 : i32
    %c0_i32_2 = arith.constant 0 : i32
    return %c0_i32, %c0_i32_0, %c0_i32_1 : i32, i32, i32
  }
  func.func @transform_3(%arg0: i32) -> (i32, i32, i32) {
    %c0_i32 = arith.constant 0 : i32
    %c0_i32_0 = arith.constant 0 : i32
    %c0_i32_1 = arith.constant 0 : i32
    %c0_i32_2 = arith.constant 0 : i32
    return %c0_i32, %c0_i32_0, %c0_i32_1 : i32, i32, i32
  }
  func.func @transform_4(%arg0: i32) -> (i32, i32, i32) {
    %c0_i32 = arith.constant 0 : i32
    %c0_i32_0 = arith.constant 0 : i32
    %c0_i32_1 = arith.constant 0 : i32
    %c0_i32_2 = arith.constant 0 : i32
    return %c0_i32, %c0_i32_0, %c0_i32_1 : i32, i32, i32
  }
  func.func @transform_5(%arg0: i32) -> (i32, i32, i32) {
    %c0_i32 = arith.constant 0 : i32
    %c0_i32_0 = arith.constant 0 : i32
    %c0_i32_1 = arith.constant 0 : i32
    %c0_i32_2 = arith.constant 0 : i32
    return %c0_i32, %c0_i32_0, %c0_i32_1 : i32, i32, i32
  }
  func.func @transform_6(%arg0: i32) -> (i32, i32, i32) {
    %c0_i32 = arith.constant 0 : i32
    %c0_i32_0 = arith.constant 0 : i32
    %c0_i32_1 = arith.constant 0 : i32
    return %c0_i32, %arg0, %c0_i32_0 : i32, i32, i32
  }
  func.func @transform_7(%arg0: i32) -> (i32, i32, i32) {
    %c0_i32 = arith.constant 0 : i32
    %c0_i32_0 = arith.constant 0 : i32
    %c0_i32_1 = arith.constant 0 : i32
    return %c0_i32, %arg0, %c0_i32_0 : i32, i32, i32
  }
}

</mosaic_0001>

<bundles_post_ra>
// kernel: tpu_custom_call.1
= control target key start
LH: loop header
LB: loop body
LE: loop exit
PB: predicated region body
PF: predicated region fallthrough
CT: control target
= control target key end

     0   :  { %s1735_s24 = smov 0   ;;  %s1737_s25 = smov 0   ;;  %s2109_s0 = inlined_call_operand.vmem [shape: f32[16,64], index: 0, kind: input, shape index: {}]   ;;  %s2110_s1 = inlined_call_operand.vmem [shape: f32[16,64], index: 1, kind: input, shape index: {}]   ;;  %s2111_s2 = inlined_call_operand.vmem [shape: f32[4,64,8], index: 2, kind: input, shape index: {}]   ;;  %s2112_s3 = inlined_call_operand.vmem [shape: f32[4,1,8], index: 3, kind: input, shape index: {}]   ;;  %s2113_s4 = inlined_call_operand.vmem [shape: f32[4,64,8], index: 4, kind: input, shape index: {}]   ;;  %s2114_s5 = inlined_call_operand.vmem [shape: f32[4,1,8], index: 5, kind: input, shape index: {}]   ;;  %s2115_s6 = inlined_call_operand.vmem [shape: f32[4,16,8], index: 6, kind: output, shape index: {0}]   ;;  %s2116_s7 = inlined_call_operand.vmem [shape: f32[4,16,8], index: 7, kind: output, shape index: {1}]  }
   0x1   :  { %s1739_s26 = smov 0  }
   0x2 LB: > { %s1748_s27 = sadd.s32 4294967295, %s1690_s26   ;;  %s1750_s28 = sadd.s32 1, %s1690_s26   ;;  %s1690_s26 = sphi %s1739_s26, %s2120_s26   ;;  %s1686_s25 = sphi %s1737_s25, %s2119_s25   ;;  %s1682_s24 = sphi %s1735_s24, %s2118_s24  }
   0x3   : > { %s158_s29 = ssub.s32 %s1690_s26, %s1750_s28  ;;  %s161_s30 = sadd.s32 1, %s1686_s25 }
   0x4   : > { %p159_p0 = scmp.eq.s32.totalorder %s158_s29, 0  ;;  %p171_p1 = scmp.ne.s32.totalorder %s1686_s25, %s1682_s24 }
   0x5   : > { %p172_p2 = scmp.eq.s32.totalorder %s1748_s27, 1  ;;  %p1234_p3 = scmp.ge.s32.totalorder %s1690_s26, 1 }
   0x6   : > { %s1758_s8 = scalar_select %p159_p0, %s1686_s25, %s161_s30  }
   0x7   : > { %p1760_p4 = por %p172_p2, %p171_p1  ;;  %p248_p5 = scmp.lt.s32.totalorder %s1690_s26, 3 }
   0x9   : > { %p249_p6 = pnand %p1234_p3, %p248_p5 }
   0xa   : > { %v295_v0 = vld [vmem:[%s2111_s2] sm:$0xff] (!%p249_p6)  ;;  %v296_v1 = vld [vmem:[%s2111_s2 + $0x8] sm:$0xff] (!%p249_p6)  ;;  %v1692_v3 = vmov (!%p249_p6), 0.0|0.0   ;;  %v297_v6 = vld [vmem:[%s2111_s2 + $0x10] sm:$0xff] (!%p249_p6)  ;;  %p286_p7 = scmp.lt.s32.totalorder (!%p249_p6), %s1748_s27, 1  ;;  %vm1693_vm0 = vmmov (!%p249_p6), 0  }
   0xb   : > { %252 = sbr.rel (%p249_p6) target bundleno = 307 (0x133), region = 44  ;;  %v387_v2 = vld [vmem:[%s2113_s4] sm:$0xff] (!%p249_p6)  ;;  %1545 = vmatprep.subr.bf16.mxu0 (!%p249_p6), %v1692_v3  ;;  %1557 = vmatprep.subr.bf16.mxu1 (!%p249_p6), %v1692_v3  ;;  %v1546_v4 = vpack.c.bf16 (!%p249_p6), %v296_v1, %v295_v0  ;;  %v388_v5 = vld [vmem:[%s2113_s4 + $0x8] sm:$0xff] (!%p249_p6)  ;;  %v298_v7 = vld [vmem:[%s2111_s2 + $0x18] sm:$0xff] (!%p249_p6)  ;;  %v1694_v11 = vmov (!%p249_p6), 0.0   ;;  %vm310_vm1 = vcmask (!%p249_p6), 523264  }
   0xc   : > { %v1558_v8 = vpack.c.bf16 (!%p249_p6), %v388_v5, %v387_v2  ;;  %v389_v9 = vld [vmem:[%s2113_s4 + $0x10] sm:$0xff] (!%p249_p6)  ;;  %v390_v10 = vld [vmem:[%s2113_s4 + $0x18] sm:$0xff] (!%p249_p6)  ;;  %1409 = vmatprep.mubr.msk.f32.mxu0 (!%p249_p6), %vm1693_vm0, %v1694_v11  ;;  %1428 = vmatprep.mubr.msk.f32.mxu1 (!%p249_p6), %vm1693_vm0, %v1694_v11  ;;  %v1549_v12 = vpack.c.bf16 (!%p249_p6), %v298_v7, %v297_v6  ;;  %v299_v14 = vld [vmem:[%s2111_s2 + $0x20] sm:$0xff] (!%p249_p6)  ;;  %s277_s10 = sand.u32 (!%p249_p6), 1, %s1682_s24   ;;  %vm384_vm2 = vcmask (!%p249_p6), 64512  }
   0xd   : > { %1547 = vmatpush3.bf16.msra.mxu0 (!%p249_p6), %v1546_v4  ;;  %v1561_v13 = vpack.c.bf16 (!%p249_p6), %v390_v10, %v389_v9  ;;  %v300_v15 = vld [vmem:[%s2111_s2 + $0x28] sm:$0xff] (!%p249_p6)  ;;  %v391_v16 = vld [vmem:[%s2113_s4 + $0x20] sm:$0xff] (!%p249_p6)  ;;  %v301_v20 = vld [vmem:[%s2111_s2 + $0x30] sm:$0xff] (!%p249_p6)  ;;  %s1235_s11 = sshll.u32 (!%p249_p6), %s277_s10, 5 }
   0xe   : > { %1559 = vmatpush3.bf16.msra.mxu1 (!%p249_p6), %v1558_v8  ;;  %1548 = vmatprep.subr.bf16.mxu0 (!%p249_p6), %v1692_v3  ;;  %v392_v17 = vld [vmem:[%s2113_s4 + $0x28] sm:$0xff] (!%p249_p6)  ;;  %v1552_v18 = vpack.c.bf16 (!%p249_p6), %v300_v15, %v299_v14  ;;  %v302_v21 = vld [vmem:[%s2111_s2 + $0x38] sm:$0xff] (!%p249_p6)  ;;  %v393_v22 = vld [vmem:[%s2113_s4 + $0x30] sm:$0xff] (!%p249_p6)  ;;  %s2041_s16 = scalar_lea.vmem (!%p249_p6), [#allocation2], %s1235_s11  ;;  %s2045_s24 = scalar_lea.vmem (!%p249_p6), [#allocation3], %s1235_s11 }
   0xf   : > { %1560 = vmatprep.subr.bf16.mxu1 (!%p249_p6), %v1692_v3  ;;  %v1564_v19 = vpack.c.bf16 (!%p249_p6), %v392_v17, %v391_v16  ;;  %v394_v23 = vld [vmem:[%s2113_s4 + $0x38] sm:$0xff] (!%p249_p6)  ;;  %v1555_v24 = vpack.c.bf16 (!%p249_p6), %v302_v21, %v301_v20  ;;  %v1243_v26 = vld [vmem:[%s2111_s2 + $0x40] sm:$0xff] (!%p249_p6)  ;;  %v1244_v27 = vld [vmem:[%s2111_s2 + $0x48] sm:$0xff] (!%p249_p6) }
  0x10   : > { %v1567_v25 = vpack.c.bf16 (!%p249_p6), %v394_v23, %v393_v22  ;;  %v1255_v28 = vld [vmem:[%s2113_s4 + $0x40] sm:$0xff] (!%p249_p6)  ;;  %v1256_v29 = vld [vmem:[%s2113_s4 + $0x48] sm:$0xff] (!%p249_p6)  ;;  %v1570_v31 = vpack.c.bf16 (!%p249_p6), %v1244_v27, %v1243_v26  ;;  %v1245_v34 = vld [vmem:[%s2111_s2 + $0x50] sm:$0xff] (!%p249_p6) }
  0x11   : > { %1550 = vmatpush3.bf16.msra.mxu0 (!%p249_p6), %v1549_v12  ;;  %v1582_v33 = vpack.c.bf16 (!%p249_p6), %v1256_v29, %v1255_v28  ;;  %v1246_v35 = vld [vmem:[%s2111_s2 + $0x58] sm:$0xff] (!%p249_p6)  ;;  %v1257_v36 = vld [vmem:[%s2113_s4 + $0x50] sm:$0xff] (!%p249_p6)  ;;  %v1247_v40 = vld [vmem:[%s2111_s2 + $0x60] sm:$0xff] (!%p249_p6) }
  0x12   : > { %s287_s17 = scalar_select %p286_p7, %s1748_s27, 1  ;;  %1562 = vmatpush3.bf16.msra.mxu1 %v1561_v13  ;;  %1551 = vmatprep.subr.bf16.mxu0 %v1692_v3  ;;  %v1258_v37 = vld [vmem:[%s2113_s4 + $0x58] sm:$0xff]  ;;  %v1573_v38 = vpack.c.bf16 %v1246_v35, %v1245_v34  ;;  %v1248_v41 = vld [vmem:[%s2111_s2 + $0x68] sm:$0xff]  ;;  %v1259_v42 = vld [vmem:[%s2113_s4 + $0x60] sm:$0xff] }
  0x13   : > { %1563 = vmatprep.subr.bf16.mxu1 %v1692_v3  ;;  %v1585_v39 = vpack.c.bf16 %v1258_v37, %v1257_v36  ;;  %v1260_v43 = vld [vmem:[%s2113_s4 + $0x68] sm:$0xff]  ;;  %v1576_v44 = vpack.c.bf16 %v1248_v41, %v1247_v40  ;;  %v1249_v46 = vld [vmem:[%s2111_s2 + $0x70] sm:$0xff]  ;;  %v1250_v47 = vld [vmem:[%s2111_s2 + $0x78] sm:$0xff] }
  0x14   : > { %s1237_s30 = sshll.u32 %s287_s17, 3  ;;  %v1588_v45 = vpack.c.bf16 %v1260_v43, %v1259_v42  ;;  %v1261_v48 = vld [vmem:[%s2113_s4 + $0x70] sm:$0xff]  ;;  %v1262_v49 = vld [vmem:[%s2113_s4 + $0x78] sm:$0xff]  ;;  %v1579_v50 = vpack.c.bf16 %v1250_v47, %v1249_v46  ;;  %v1267_v52 = vld [vmem:[%s2111_s2 + $0x80] sm:$0xff] }
  0x15   : > { %1553 = vmatpush3.bf16.msra.mxu0 %v1552_v18  ;;  %s289_s12 = scalar_lea.vmem %s2109_s0, %s1237_s30  ;;  %s293_s19 = scalar_lea.vmem %s2110_s1, %s1237_s30  ;;  %v1591_v51 = vpack.c.bf16 %v1262_v49, %v1261_v48  ;;  %v1268_v53 = vld [vmem:[%s2111_s2 + $0x88] sm:$0xff]  ;;  %v1279_v54 = vld [vmem:[%s2113_s4 + $0x80] sm:$0xff]  ;;  %v1269_v58 = vld [vmem:[%s2111_s2 + $0x90] sm:$0xff] }
  0x16   : > { %1565 = vmatpush3.bf16.msra.mxu1 %v1564_v19  ;;  %1554 = vmatprep.subr.bf16.mxu0 %v1692_v3  ;;  %v1846_v30 = vld [vmem:[%s289_s12] sm:$0xff]  ;;  %v1280_v55 = vld [vmem:[%s2113_s4 + $0x88] sm:$0xff]  ;;  %v1594_v56 = vpack.c.bf16 %v1268_v53, %v1267_v52  ;;  %v1270_v59 = vld [vmem:[%s2111_s2 + $0x98] sm:$0xff]  ;;  %s1317_s12 = sshll.u32 (%p1760_p4), %s1748_s27, 3 }
  0x17   : > { %1566 = vmatprep.subr.bf16.mxu1 %v1692_v3  ;;  %v1848_v32 = vld [vmem:[%s293_s19] sm:$0xff]  ;;  %v1606_v57 = vpack.c.bf16 %v1280_v55, %v1279_v54  ;;  %v1281_v60 = vld [vmem:[%s2113_s4 + $0x90] sm:$0xff]  ;;  %v1282_v61 = vld [vmem:[%s2113_s4 + $0x98] sm:$0xff]  ;;  %v1597_v62 = vpack.c.bf16 %v1270_v59, %v1269_v58  ;;  %s1046_s15 = scalar_lea.vmem (%p1760_p4), %s2115_s6, %s1317_s12 }
  0x18   : > { %v1609_v63 = vpack.c.bf16 %v1282_v61, %v1281_v60  ;;  %v1271_v0 = vld [vmem:[%s2111_s2 + $0xa0] sm:$0xff]  ;;  %v1272_v1 = vld [vmem:[%s2111_s2 + $0xa8] sm:$0xff]  ;;  %v1273_v7 = vld [vmem:[%s2111_s2 + $0xb0] sm:$0xff] }
  0x19   : > { %1556 = vmatpush3.bf16.msra.mxu0 %v1555_v24  ;;  %v1283_v2 = vld [vmem:[%s2113_s4 + $0xa0] sm:$0xff]  ;;  %v1284_v4 = vld [vmem:[%s2113_s4 + $0xa8] sm:$0xff]  ;;  %v1600_v5 = vpack.c.bf16 %v1272_v1, %v1271_v0  ;;  %v1274_v8 = vld [vmem:[%s2111_s2 + $0xb8] sm:$0xff] }
  0x1a   : > { %1568 = vmatpush3.bf16.msra.mxu1 %v1567_v25  ;;  %1569 = vmatprep.subr.bf16.mxu0 %v1692_v3  ;;  %v1612_v6 = vpack.c.bf16 %v1284_v4, %v1283_v2  ;;  %v1285_v9 = vld [vmem:[%s2113_s4 + $0xb0] sm:$0xff]  ;;  %v1286_v10 = vld [vmem:[%s2113_s4 + $0xb8] sm:$0xff]  ;;  %v1603_v12 = vpack.c.bf16 %v1274_v8, %v1273_v7  ;;  %v1291_v14 = vld [vmem:[%s2111_s2 + $0xc0] sm:$0xff] }
  0x1b   : > { %1581 = vmatprep.subr.bf16.mxu1 %v1692_v3  ;;  %v1615_v13 = vpack.c.bf16 %v1286_v10, %v1285_v9  ;;  %v1292_v15 = vld [vmem:[%s2111_s2 + $0xc8] sm:$0xff]  ;;  %v1303_v16 = vld [vmem:[%s2113_s4 + $0xc0] sm:$0xff]  ;;  %v1293_v20 = vld [vmem:[%s2111_s2 + $0xd0] sm:$0xff] }
  0x1c   : > { %1410 = vmatmul.mubr.msk.f32.vlgmr.msra.gmra.mrb[0].mxu0 %vm310_vm1, %v1846_v30  ;;  %v1304_v17 = vld [vmem:[%s2113_s4 + $0xc8] sm:$0xff]  ;;  %v1618_v18 = vpack.c.bf16 %v1292_v15, %v1291_v14  ;;  %v1294_v21 = vld [vmem:[%s2111_s2 + $0xd8] sm:$0xff]  ;;  %v1305_v22 = vld [vmem:[%s2113_s4 + $0xd0] sm:$0xff] }
  0x1d   : > { %1429 = vmatmul.mubr.msk.f32.vlgmr.msra.gmra.mrb[0].mxu1 %vm310_vm1, %v1848_v32  ;;  %1571 = vmatpush3.bf16.msra.mxu0 %v1570_v31  ;;  %v1630_v19 = vpack.c.bf16 %v1304_v17, %v1303_v16  ;;  %v1306_v23 = vld [vmem:[%s2113_s4 + $0xd8] sm:$0xff]  ;;  %v1621_v24 = vpack.c.bf16 %v1294_v21, %v1293_v20  ;;  %v1295_v26 = vld [vmem:[%s2111_s2 + $0xe0] sm:$0xff]  ;;  %v1296_v27 = vld [vmem:[%s2111_s2 + $0xe8] sm:$0xff] }
  0x1e   : > { %1583 = vmatpush3.bf16.msra.mxu1 %v1582_v33  ;;  %1572 = vmatprep.subr.bf16.mxu0 %v1692_v3  ;;  %v1633_v25 = vpack.c.bf16 %v1306_v23, %v1305_v22  ;;  %v1307_v28 = vld [vmem:[%s2113_s4 + $0xe0] sm:$0xff]  ;;  %v1308_v29 = vld [vmem:[%s2113_s4 + $0xe8] sm:$0xff]  ;;  %v1624_v31 = vpack.c.bf16 %v1296_v27, %v1295_v26  ;;  %v1297_v34 = vld [vmem:[%s2111_s2 + $0xf0] sm:$0xff] }
  0x1f   : > { %1584 = vmatprep.subr.bf16.mxu1 %v1692_v3  ;;  %1447 = vmatprep.mubr.msk.f32.mxu0 %vm1693_vm0, %v1694_v11  ;;  %v1636_v33 = vpack.c.bf16 %v1308_v29, %v1307_v28  ;;  %v1298_v35 = vld [vmem:[%s2111_s2 + $0xf8] sm:$0xff]  ;;  %v1241_v40 = vld [vmem:[%s2114_s5] ss:$0 sm:$0xff]  ;;  %v1276_v52 = vld [vmem:[%s2112_s3 + $0x2] ss:$0 sm:$0xff] }
  0x20   : > { %1466 = vmatprep.mubr.msk.f32.mxu1 %vm1693_vm0, %v1694_v11  ;;  %v1310_v36 = vld [vmem:[%s2113_s4 + $0xf8] sm:$0xff]  ;;  %v1627_v37 = vpack.c.bf16 %v1298_v35, %v1297_v34  ;;  %v1288_v53 = vld [vmem:[%s2114_s5 + $0x2] ss:$0 sm:$0xff]  ;;  %v1300_v60 = vld [vmem:[%s2112_s3 + $0x3] ss:$0 sm:$0xff] }
  0x21   : > { %1574 = vmatpush3.bf16.msra.mxu0 %v1573_v38  ;;  %v1312_v61 = vld [vmem:[%s2114_s5 + $0x3] ss:$0 sm:$0xff] }
  0x22   : > { %1586 = vmatpush3.bf16.msra.mxu1 %v1585_v39  ;;  %1575 = vmatprep.subr.bf16.mxu0 %v1692_v3  ;;  %v1239_v39 = vld [vmem:[%s2112_s3] ss:$0 sm:$0xff] }
  0x23   : > { %1587 = vmatprep.subr.bf16.mxu1 %v1692_v3 }
  0x25   : > { %1577 = vmatpush3.bf16.msra.mxu0 %v1576_v44 }
  0x26   : > { %1589 = vmatpush3.bf16.msra.mxu1 %v1588_v45  ;;  %1578 = vmatprep.subr.bf16.mxu0 %v1692_v3  ;;  %v1264_v45 = vld [vmem:[%s2114_s5 + $0x1] ss:$0 sm:$0xff] }
  0x27   : > { %1590 = vmatprep.subr.bf16.mxu1 %v1692_v3 }
  0x29   : > { %1580 = vmatpush3.bf16.msra.mxu0 %v1579_v50 }
  0x2a   : > { %1592 = vmatpush3.bf16.msra.mxu1 %v1591_v51  ;;  %1593 = vmatprep.subr.bf16.mxu0 %v1692_v3 }
  0x2b   : > { %1605 = vmatprep.subr.bf16.mxu1 %v1692_v3 }
  0x2c   : > { %1448 = vmatmul.mubr.msk.f32.vlgmr.msra.gmra.mrb[2].mxu0 %vm310_vm1, %v1846_v30 }
  0x2d   : > { %1467 = vmatmul.mubr.msk.f32.vlgmr.msra.gmra.mrb[2].mxu1 %vm310_vm1, %v1848_v32  ;;  %1595 = vmatpush3.bf16.msra.mxu0 %v1594_v56 }
  0x2e   : > { %1607 = vmatpush3.bf16.msra.mxu1 %v1606_v57  ;;  %1596 = vmatprep.subr.bf16.mxu0 %v1692_v3 }
  0x2f   : > { %1608 = vmatprep.subr.bf16.mxu1 %v1692_v3  ;;  %1485 = vmatprep.mubr.msk.f32.mxu0 %vm1693_vm0, %v1694_v11 }
  0x30   : > { %1504 = vmatprep.mubr.msk.f32.mxu1 %vm1693_vm0, %v1694_v11 }
  0x31   : > { %1598 = vmatpush3.bf16.msra.mxu0 %v1597_v62 }
  0x32   : > { %1610 = vmatpush3.bf16.msra.mxu1 %v1609_v63  ;;  %1599 = vmatprep.subr.bf16.mxu0 %v1692_v3 }
  0x33   : > { %1611 = vmatprep.subr.bf16.mxu1 %v1692_v3 }
  0x35   : > { %1601 = vmatpush3.bf16.msra.mxu0 %v1600_v5 }
  0x36   : > { %1613 = vmatpush3.bf16.msra.mxu1 %v1612_v6  ;;  %1602 = vmatprep.subr.bf16.mxu0 %v1692_v3 }
  0x37   : > { %1614 = vmatprep.subr.bf16.mxu1 %v1692_v3 }
  0x39   : > { %1604 = vmatpush3.bf16.msra.mxu0 %v1603_v12 }
  0x3a   : > { %1616 = vmatpush3.bf16.msra.mxu1 %v1615_v13  ;;  %1617 = vmatprep.subr.bf16.mxu0 %v1692_v3 }
  0x3b   : > { %1629 = vmatprep.subr.bf16.mxu1 %v1692_v3 }
  0x3c   : > { %1486 = vmatmul.mubr.msk.f32.vlgmr.msra.gmra.mrb[4].mxu0 %vm310_vm1, %v1846_v30 }
  0x3d   : > { %1505 = vmatmul.mubr.msk.f32.vlgmr.msra.gmra.mrb[4].mxu1 %vm310_vm1, %v1848_v32  ;;  %1619 = vmatpush3.bf16.msra.mxu0 %v1618_v18 }
  0x3e   : > { %1631 = vmatpush3.bf16.msra.mxu1 %v1630_v19  ;;  %1620 = vmatprep.subr.bf16.mxu0 %v1692_v3 }
  0x3f   : > { %1632 = vmatprep.subr.bf16.mxu1 %v1692_v3  ;;  %1523 = vmatprep.mubr.msk.f32.mxu0 %vm1693_vm0, %v1694_v11 }
  0x40   : > { %1542 = vmatprep.mubr.msk.f32.mxu1 %vm1693_vm0, %v1694_v11  ;;  %v1309_v11 = vld [vmem:[%s2113_s4 + $0xf0] sm:$0xff] }
  0x41   : > { %1622 = vmatpush3.bf16.msra.mxu0 %v1621_v24  ;;  %v1639_v38 = vpack.c.bf16 %v1310_v36, %v1309_v11 }
  0x42   : > { %1634 = vmatpush3.bf16.msra.mxu1 %v1633_v25  ;;  %1623 = vmatprep.subr.bf16.mxu0 %v1692_v3 }
  0x43   : > { %1635 = vmatprep.subr.bf16.mxu1 %v1692_v3 }
  0x45   : > { %1625 = vmatpush3.bf16.msra.mxu0 %v1624_v31 }
  0x46   : > { %1637 = vmatpush3.bf16.msra.mxu1 %v1636_v33  ;;  %1626 = vmatprep.subr.bf16.mxu0 %v1692_v3 }
  0x47   : > { %1638 = vmatprep.subr.bf16.mxu1 %v1692_v3 }
  0x49   : > { %1628 = vmatpush3.bf16.msra.mxu0 %v1627_v37 }
  0x4a   : > { %1640 = vmatpush3.bf16.msra.mxu1 %v1639_v38 }
  0x4c   : > { %1524 = vmatmul.mubr.msk.f32.vlgmr.msra.gmra.mrb[6].mxu0 %vm310_vm1, %v1846_v30 }
  0x4d   : > { %1543 = vmatmul.mubr.msk.f32.vlgmr.msra.gmra.mrb[6].mxu1 %vm310_vm1, %v1848_v32  ;;  %v1252_v32 = vld [vmem:[%s2112_s3 + $0x1] ss:$0 sm:$0xff] }
  0xef   : > { %v380_v41 = vpop.f32.mrb[0].mxu0 }
  0xf0   : > { %v381_v3 = vadd.f32 %v1239_v39, %v380_v41  ;;  %v471_v42 = vpop.f32.mrb[0].mxu1  ;;  %v1411_v43 = vpop.f32.mrb[1].mxu0 }
  0xf1   : > { %v472_v44 = vadd.f32 %v1241_v40, %v471_v42  ;;  %v1430_v30 = vpop.f32.mrb[1].mxu1 }
  0xf2   : > { %385 = vst.msk [vmem:[%s2041_s16] sm:$0xff] %vm384_vm2, %v381_v3 }
  0xf3   : > { %475 = vst.msk [vmem:[%s2045_s24] sm:$0xff] %vm384_vm2, %v472_v44 }
  0xf9   : > { %v1080_v5 = vld [vmem:[%s2041_s16] sm:$0xff] (%p1760_p4) }
  0xfa   : > { %1081 = vst [vmem:[%s1046_s15] sm:$0xff] (%p1760_p4), %v1080_v5 }
  0xff   : > { %v563_v46 = vpop.f32.mrb[2].mxu0 }
 0x100   : > { %v564_v47 = vadd.f32 %v1252_v32, %v563_v46  ;;  %v656_v48 = vpop.f32.mrb[2].mxu1  ;;  %v1449_v49 = vpop.f32.mrb[3].mxu0 }
 0x101   : > { %v657_v50 = vadd.f32 %v1264_v45, %v656_v48  ;;  %v1468_v51 = vpop.f32.mrb[3].mxu1 }
 0x102   : > { %1254 = vst.msk [vmem:[%s2041_s16 + $0x8] sm:$0xff] %vm384_vm2, %v564_v47 }
 0x103   : > { %1266 = vst.msk [vmem:[%s2045_s24 + $0x8] sm:$0xff] %vm384_vm2, %v657_v50 }
 0x109   : > { %v1082_v6 = vld [vmem:[%s2041_s16 + $0x8] sm:$0xff] (%p1760_p4) }
 0x10a   : > { %1083 = vst [vmem:[%s1046_s15 + $0x10] sm:$0xff] (%p1760_p4), %v1082_v6 }
 0x10f   : > { %v749_v54 = vpop.f32.mrb[4].mxu0 }
 0x110   : > { %v750_v55 = vadd.f32 %v1276_v52, %v749_v54  ;;  %v842_v56 = vpop.f32.mrb[4].mxu1  ;;  %v1487_v57 = vpop.f32.mrb[5].mxu0 }
 0x111   : > { %v843_v58 = vadd.f32 %v1288_v53, %v842_v56  ;;  %v1506_v59 = vpop.f32.mrb[5].mxu1 }
 0x112   : > { %1278 = vst.msk [vmem:[%s2041_s16 + $0x10] sm:$0xff] %vm384_vm2, %v750_v55 }
 0x113   : > { %1290 = vst.msk [vmem:[%s2045_s24 + $0x10] sm:$0xff] %vm384_vm2, %v843_v58 }
 0x119   : > { %v1084_v7 = vld [vmem:[%s2041_s16 + $0x10] sm:$0xff] (%p1760_p4) }
 0x11a   : > { %1085 = vst [vmem:[%s1046_s15 + $0x20] sm:$0xff] (%p1760_p4), %v1084_v7 }
 0x11d   : > { %1044 = sbr.rel (!%p1760_p4) target bundleno = 299 (0x12b), region = 48 }
 0x11f   : > { %v935_v62 = vpop.f32.mrb[6].mxu0 }
 0x120   : > { %v936_v63 = vadd.f32 %v1300_v60, %v935_v62  ;;  %v1028_v0 = vpop.f32.mrb[6].mxu1  ;;  %v1525_v1 = vpop.f32.mrb[7].mxu0 }
 0x121   : > { %v1029_v2 = vadd.f32 %v1312_v61, %v1028_v0  ;;  %v1544_v4 = vpop.f32.mrb[7].mxu1 }
 0x122   : > { %1302 = vst.msk [vmem:[%s2041_s16 + $0x18] sm:$0xff] %vm384_vm2, %v936_v63 }
 0x123   : > { %1314 = vst.msk [vmem:[%s2045_s24 + $0x18] sm:$0xff] %vm384_vm2, %v1029_v2 }
 0x129   : > { %v1086_v8 = vld [vmem:[%s2041_s16 + $0x18] sm:$0xff] }
 0x12a   : > { %1087 = vst [vmem:[%s1046_s15 + $0x30] sm:$0xff] %v1086_v8 }
 0x12b PF: > { %1093 = sbr.rel (!%p1760_p4) target bundleno = 307 (0x133), region = 86  ;;  %s1318_s17 = sshll.u32 (%p1760_p4), %s1748_s27, 3  ;;  %v1129_v9 = vld [vmem:[%s2045_s24] sm:$0xff] (%p1760_p4)  ;;  %v1131_v10 = vld [vmem:[%s2045_s24 + $0x8] sm:$0xff] (%p1760_p4)  ;;  %v1133_v12 = vld [vmem:[%s2045_s24 + $0x10] sm:$0xff] (%p1760_p4) }
 0x12c   : > { %s1095_s16 = scalar_lea.vmem (%p1760_p4), %s2116_s7, %s1318_s17 }
 0x12d   : > { %1130 = vst [vmem:[%s1095_s16] sm:$0xff] (%p1760_p4), %v1129_v9  ;;  %1132 = vst [vmem:[%s1095_s16 + $0x10] sm:$0xff] (%p1760_p4), %v1131_v10 }
 0x12e   : > { %1134 = vst [vmem:[%s1095_s16 + $0x20] sm:$0xff] (%p1760_p4), %v1133_v12 }
 0x131   : > { %v1135_v13 = vld [vmem:[%s2045_s24 + $0x18] sm:$0xff] (%p1760_p4) }
 0x132   : > { %1136 = vst [vmem:[%s1095_s16 + $0x30] sm:$0xff] %v1135_v13 }
 0x133 PF: > { %p15_p8 = scmp.ge.s32.totalorder %s1750_s28, 4   ;;  %s2118_s24 = smov %s1686_s25 }
 0x134   : > { %s2119_s25 = smov %s1758_s8  ;;  %s2120_s26 = smov %s1750_s28 }
 0x135   :  { %17 = sbr.rel (!%p15_p8) target bundleno = 2 (0x2), region = 183 }

</bundles_post_ra>
